<compile_context>
chip_gen: v7x
topology: tpu7x:2x2x1
jax: 0.10.0
libtpu: 0.0.40
codegen_flags: <defaults>
</compile_context>

<pallas_src>
import jax
import jax.numpy as jnp
from jax.experimental import pallas as pl
from jax.experimental.pallas import tpu as pltpu


# ------------------------------ tuning constants ----------------------------- #

_LANE_CANDIDATES = (4096, 2048, 1024, 512, 256, 128)   # lane-dense minor dims
_RAGGED_CHUNK = 128 * 1024         # elems per block in the ragged fallback
_MAX_TILE_BYTES = 8 << 20          # per-tile budget (dtype aware)
_VMEM_LIMIT_BYTES = 40 << 20       # explicit scoped-VMEM limit (safe on v5e/v6e/v7x)


# -------------------------------- Pallas kernels ----------------------------- #

def _noop_kernel(x_ref, o_ref):
    # Row-major reshape is pure metadata: the output aliases the input buffer
    # (input_output_aliases={0: 0}), so there is nothing to move or compute.
    del x_ref, o_ref


def _copy_kernel(x_ref, o_ref):
    # Whole-tile lane-dense copy (materializing path only).
    o_ref[...] = x_ref[...]


# ------------------------------- shape utilities ----------------------------- #

def _resolve_shape(total, shape):
    """Resolve a torch.view-style shape (may contain one -1)."""
    shape = tuple(int(s) for s in shape)
    if shape.count(-1) > 1:
        raise ValueError(f"only one -1 allowed in shape {shape}")
    if -1 in shape:
        idx = shape.index(-1)
        known = 1
        for i, s in enumerate(shape):
            if i != idx:
                known *= s
        if known == 0 or total % known != 0:
            raise ValueError(f"cannot reshape {total} elements into {shape}")
        shape = shape[:idx] + (total // known,) + shape[idx + 1:]
    prod = 1
    for s in shape:
        prod *= s
    if prod != total:
        raise ValueError(f"cannot reshape {total} elements into {shape}")
    return shape


def _pick_lane(total):
    # Widest multiple-of-128 minor dim dividing the element count: lane-dense
    # slabs -> unmasked full-lane vector loads/stores.
    for lane in _LANE_CANDIDATES:
        if total % lane == 0:
            return lane
    return None


def _pick_row_block(rows, lane, itemsize):
    # Dtype-aware tile budget; row blocks rounded to multiples of 32 so packed
    # sublanes (bf16: 16 rows, int8: 32 rows) stay unmasked.  Partial last
    # blocks are handled by Pallas (pl.cdiv grid), so no divisibility needed.
    max_rows = max(32, (_MAX_TILE_BYTES // (lane * itemsize)) // 32 * 32)
    if rows <= max_rows:
        return rows                 # single full-extent block (always legal)
    return max_rows                 # bounded, multiple of 32


# ---------------------------------- reshape paths ---------------------------- #

def _aliased_reshape(x, out_shape):
    """Zero-copy path: output aliases the input buffer; no HBM traffic."""
    x_view = jnp.reshape(x, out_shape)        # metadata plumbing, not compute
    return pl.pallas_call(
        _noop_kernel,
        out_shape=jax.ShapeDtypeStruct(out_shape, x.dtype),
        in_specs=[pl.BlockSpec(memory_space=pl.ANY)],
        out_specs=pl.BlockSpec(memory_space=pl.ANY),
        input_output_aliases={0: 0},
    )(x_view)


def _copy_reshape(x, out_shape):
    """Materializing path: tiled lane-dense copy into a fresh buffer."""
    total = x.size
    itemsize = jnp.dtype(x.dtype).itemsize
    lane = _pick_lane(total)
    compiler_params = pltpu.CompilerParams(
        dimension_semantics=("parallel",),      # harmless; v7x 2-TC sharding
        vmem_limit_bytes=_VMEM_LIMIT_BYTES,
    )

    if lane is None:
        # Ragged element count (not a multiple of 128): bounded chunks along
        # the lane axis of a flat (1, total) slab; last partial block is fine.
        flat = jnp.reshape(x, (1, total))
        chunk = total if total <= _RAGGED_CHUNK else _RAGGED_CHUNK
        grid = (pl.cdiv(total, chunk),)
        out = pl.pallas_call(
            _copy_kernel,
            out_shape=jax.ShapeDtypeStruct((1, total), x.dtype),
            grid_spec=pltpu.PrefetchScalarGridSpec(
                num_scalar_prefetch=0,
                grid=grid,
                in_specs=[pl.BlockSpec((1, chunk), lambda i: (0, i))],
                out_specs=pl.BlockSpec((1, chunk), lambda i: (0, i)),
            ),
            compiler_params=compiler_params,
        )(flat)
        return jnp.reshape(out, out_shape)

    rows = total // lane
    x2 = jnp.reshape(x, (rows, lane))           # metadata plumbing
    block_rows = _pick_row_block(rows, lane, itemsize)
    grid = (pl.cdiv(rows, block_rows),)
    out2 = pl.pallas_call(
        _copy_kernel,
        out_shape=jax.ShapeDtypeStruct((rows, lane), x.dtype),
        grid_spec=pltpu.PrefetchScalarGridSpec(
            num_scalar_prefetch=0,
            grid=grid,
            in_specs=[pl.BlockSpec((block_rows, lane), lambda i: (i, 0))],
            out_specs=pl.BlockSpec((block_rows, lane), lambda i: (i, 0)),
        ),
        compiler_params=compiler_params,
    )(x2)
    return jnp.reshape(out2, out_shape)


# --------------------------------- public wrapper ---------------------------- #

def pallas_reshape(x, shape, materialize=False):
    """Pallas equivalent of `x.view(shape)` (row-major reshape).

    Default: zero-copy (output aliases the input buffer).
    materialize=True: explicit tiled copy into a fresh buffer.
    """
    out_shape = _resolve_shape(x.size, shape)
    if x.size == 0:
        # Zero-sized reshape is metadata only; skip the device entirely.
        return jnp.reshape(x, out_shape)
    if materialize:
        return _copy_reshape(x, out_shape)
    return _aliased_reshape(x, out_shape)


class Reshape:
    """Drop-in functional analogue of the PyTorch Reshape module."""

    def __init__(self, *args):
        self.shape = args

    def __call__(self, x):
        return pallas_reshape(x, self.shape)


# ------------------------------------- main ---------------------------------- #

if __name__ == "__main__":
    key = jax.random.PRNGKey(0)
    x = jax.random.normal(key, (2, 4, 16, 16), jnp.float32)

    # Encoder-style flatten: (2, 4, 16, 16) -> (2, 1024)  (zero-copy path).
    mod = Reshape(2, -1)
    out = jax.block_until_ready(mod(x))
    ref = jnp.reshape(x, (2, -1))
    assert out.shape == (2, 1024), out.shape
    assert out.dtype == x.dtype, out.dtype
    assert jnp.array_equal(out, ref), float(jnp.max(jnp.abs(out - ref)))

    # Decoder-style un-flatten with -1 leading dim (zero-copy path).
    mod2 = Reshape(-1, 16, 8, 8)
    out2 = jax.block_until_ready(mod2(x))
    assert out2.shape == (2, 16, 8, 8), out2.shape
    assert jnp.array_equal(out2, jnp.reshape(x, (-1, 16, 8, 8)))

    # Explicit materializing path: tiled lane-dense Pallas copy.
    out3 = jax.block_until_ready(pallas_reshape(x, (2, -1), materialize=True))
    assert out3.shape == (2, 1024), out3.shape
    assert jnp.array_equal(out3, ref)

    # Ragged element count (not a multiple of 128) through the copy path.
    y = jax.random.normal(jax.random.PRNGKey(1), (2, 3, 5), jnp.float32)
    out4 = jax.block_until_ready(pallas_reshape(y, (6, 5), materialize=True))
    assert out4.shape == (6, 5), out4.shape
    assert jnp.array_equal(out4, jnp.reshape(y, (6, 5)))

    print("KERNEL_OK")
</pallas_src>

<mosaic_0001>
module attributes {stable_mosaic.version = 11 : i64} {
  func.func @_noop_kernel(%arg0: memref<2x1024xf32, #tpu.memory_space<any>>, %arg1: memref<2x1024xf32, #tpu.memory_space<any>>) attributes {dimension_semantics = [], scalar_prefetch = 0 : i64, scratch_operands = 0 : i64, tpu.core_type = #tpu.core_type<tc>} {
    return
  }
}

</mosaic_0001>

<bundles_post_ra>
// kernel: tpu_custom_call.1
= control target key start
LH: loop header
LB: loop body
LE: loop exit
PB: predicated region body
PF: predicated region fallthrough
CT: control target
= control target key end

     0   :  { %s16_s0 = inlined_call_operand.hbm [shape: f32[2,1024], index: 0, kind: input, shape index: {}, may-alias: {0,1}]   ;;  %s17_s1 = inlined_call_operand.hbm [shape: f32[2,1024], index: 1, kind: output, shape index: {}, may-alias: {0,1}]  }

</bundles_post_ra>
